<compile_context>
chip_gen: v6e
topology: v6e:2x2x1
jax: 0.10.0
libtpu: 0.0.40
codegen_flags: <defaults>
</compile_context>

<pallas_src>
import functools

import jax
import jax.numpy as jnp
from jax.experimental import pallas as pl
from jax.experimental.pallas import tpu as pltpu


def _round_up(x, m):
    return ((x + m - 1) // m) * m


# ---------------------------------------------------------------------------
# Fused lm_head (+ optional shifted cross-entropy) kernel body.
#   single_k=True : grid = (rows, vocab)            -- no accumulator scratch
#   single_k=False: grid = (rows, vocab, hidden)    -- f32 accumulator, k innermost
# ---------------------------------------------------------------------------
def _lm_head_ce_kernel(*refs, v_real, v_pad, single_k, with_ce):
    if with_ce:
        h_ref, w_ref, lab_ref = refs[:3]
        logits_ref, nll_ref = refs[3:5]
        scratch = refs[5:]
    else:
        h_ref, w_ref = refs[:2]
        logits_ref = refs[2]
        lab_ref = nll_ref = None
        scratch = refs[3:]
    acc_ref = None
    if not single_k:
        acc_ref, scratch = scratch[0], scratch[1:]
    if with_ce:
        m_ref, l_ref, lab_sum_ref = scratch

    j = pl.program_id(1)
    nj = pl.num_programs(1)

    def finalize(tile):
        # `tile` is the final [tm, tn] f32 logits block for this (i, j).
        logits_ref[...] = tile.astype(logits_ref.dtype)
        if not with_ce:
            return

        tm, tn = tile.shape
        # Column ids are needed in EVERY vocab tile for the label-logit gather.
        col = j * tn + jax.lax.broadcasted_iota(jnp.int32, (tm, tn), 1)
        labels = lab_ref[...]                                   # [tm, 1] int32

        def fold(lt):
            m_prev = m_ref[...]
            m_new = jnp.maximum(m_prev, jnp.max(lt, axis=-1, keepdims=True))
            p = jnp.exp(lt - m_new)
            l_ref[...] = (l_ref[...] * jnp.exp(m_prev - m_new)
                          + jnp.sum(p, axis=-1, keepdims=True))
            m_ref[...] = m_new
            lab_sum_ref[...] += jnp.sum(
                jnp.where(col == labels, lt, 0.0), axis=-1, keepdims=True)

        if v_pad == v_real:
            # tn | V: no padded vocab columns anywhere -> no mask at all.
            fold(tile)
        else:
            # Only the LAST vocab tile can contain padded columns (v_pad - V < tn,
            # so it always has >= 1 real column and m_new stays finite).  Gate the
            # compare+select there; other tiles fold the raw tile.
            @pl.when(j == nj - 1)
            def _():
                fold(jnp.where(col < v_real, tile, -jnp.inf))

            @pl.when(j < nj - 1)
            def _():
                fold(tile)

        # Last vocab tile: emit per-row NLL (0 for ignored / padded rows).
        @pl.when(j == nj - 1)
        def _():
            valid_row = (labels >= 0) & (labels < v_real)
            nll = m_ref[...] + jnp.log(l_ref[...]) - lab_sum_ref[...]
            nll_ref[...] = jnp.where(valid_row, nll, 0.0)

    # [tm, tk] x [tn, tk] contracted on dim 1 -> [tm, tn]; weight stays [V, H]
    # (MXU handles the transposed-RHS contraction; no per-tile vxpose, no HBM
    # transpose copy in the wrapper).
    def partial_matmul():
        return jax.lax.dot_general(
            h_ref[...], w_ref[...],
            dimension_numbers=(((1,), (1,)), ((), ())),
            preferred_element_type=jnp.float32)

    if single_k:
        if with_ce:
            @pl.when(j == 0)
            def _():
                m_ref[...] = jnp.full_like(m_ref, -jnp.inf)
                l_ref[...] = jnp.zeros_like(l_ref)
                lab_sum_ref[...] = jnp.zeros_like(lab_sum_ref)
        # Whole-H contraction in one shot: no accumulator read-modify-write.
        finalize(partial_matmul())
    else:
        k = pl.program_id(2)
        nk = pl.num_programs(2)
        if with_ce:
            @pl.when((j == 0) & (k == 0))
            def _():
                m_ref[...] = jnp.full_like(m_ref, -jnp.inf)
                l_ref[...] = jnp.zeros_like(l_ref)
                lab_sum_ref[...] = jnp.zeros_like(lab_sum_ref)

        @pl.when(k == 0)
        def _():
            acc_ref[...] = jnp.zeros_like(acc_ref)

        acc_ref[...] += partial_matmul()

        @pl.when(k == nk - 1)
        def _():
            finalize(acc_ref[...])


def _fused_lm_head_ce(hidden_2d, weight_vh, shift_labels=None, *,
                      tm=512, tn=1024, tk=1024,
                      compute_dtype=jnp.bfloat16, logits_dtype=jnp.float32):
    """hidden_2d: [N, H], weight_vh: [V, H] (NOT transposed),
    shift_labels: optional [N] int (next-token labels, -100 = ignore).
    Returns logits [N, V] (and per-row NLL [N] if shift_labels is given)."""
    N, H = hidden_2d.shape
    V = weight_vh.shape[0]
    with_ce = shift_labels is not None

    # ---- tile selection -----------------------------------------------------
    tm = min(tm, _round_up(N, 8))
    # v7x megacore: keep >= 2 row tiles when there is enough work so the
    # "parallel" i axis actually splits across both TensorCores.
    if tm > 256 and _round_up(N, tm) // tm < 2:
        tm = max(256, _round_up((N + 1) // 2, 256))
    tn = min(tn, _round_up(V, 128))
    tk = min(tk, _round_up(H, 128))
    n_pad = _round_up(N, tm)
    v_pad = _round_up(V, tn)
    h_pad = _round_up(H, tk)
    single_k = (h_pad == tk)          # H fits in one K tile -> drop the k grid axis

    # ---- operand preparation (pad / cast only when actually needed) ---------
    h_p = hidden_2d if hidden_2d.dtype == compute_dtype else hidden_2d.astype(compute_dtype)
    if (n_pad, h_pad) != (N, H):
        h_p = jnp.pad(h_p, ((0, n_pad - N), (0, h_pad - H)))
    w_p = weight_vh if weight_vh.dtype == compute_dtype else weight_vh.astype(compute_dtype)
    if (v_pad, h_pad) != (V, H):
        w_p = jnp.pad(w_p, ((0, v_pad - V), (0, h_pad - H)))
    if with_ce:
        lab = shift_labels.astype(jnp.int32)
        if n_pad != N:
            lab = jnp.full((n_pad,), -100, jnp.int32).at[:N].set(lab)
        lab_p = lab.reshape(n_pad, 1)

    # ---- grid / specs --------------------------------------------------------
    if single_k:
        grid = (n_pad // tm, v_pad // tn)
        h_spec = pl.BlockSpec((tm, tk), lambda i, j: (i, 0))
        w_spec = pl.BlockSpec((tn, tk), lambda i, j: (j, 0))
        lab_spec = pl.BlockSpec((tm, 1), lambda i, j: (i, 0))
        logits_spec = pl.BlockSpec((tm, tn), lambda i, j: (i, j))
        nll_spec = pl.BlockSpec((tm, 1), lambda i, j: (i, 0))
        dims = ("parallel", "arbitrary" if with_ce else "parallel")
        scratch = []
    else:
        grid = (n_pad // tm, v_pad // tn, h_pad // tk)
        h_spec = pl.BlockSpec((tm, tk), lambda i, j, k: (i, k))
        w_spec = pl.BlockSpec((tn, tk), lambda i, j, k: (j, k))
        lab_spec = pl.BlockSpec((tm, 1), lambda i, j, k: (i, 0))
        logits_spec = pl.BlockSpec((tm, tn), lambda i, j, k: (i, j))
        nll_spec = pl.BlockSpec((tm, 1), lambda i, j, k: (i, 0))
        dims = ("parallel", "arbitrary", "arbitrary")
        scratch = [pltpu.VMEM((tm, tn), jnp.float32)]           # matmul accumulator

    if with_ce:
        scratch += [pltpu.VMEM((tm, 1), jnp.float32),           # running row max
                    pltpu.VMEM((tm, 1), jnp.float32),           # running sum-exp
                    pltpu.VMEM((tm, 1), jnp.float32)]           # gathered label logit
        in_specs = [h_spec, w_spec, lab_spec]
        out_specs = [logits_spec, nll_spec]
        out_shape = (jax.ShapeDtypeStruct((n_pad, v_pad), logits_dtype),
                     jax.ShapeDtypeStruct((n_pad, 1), jnp.float32))
        inputs = (h_p, w_p, lab_p)
    else:
        in_specs = [h_spec, w_spec]
        out_specs = logits_spec
        out_shape = jax.ShapeDtypeStruct((n_pad, v_pad), logits_dtype)
        inputs = (h_p, w_p)

    # ---- VMEM budget + scheduler cost hint -----------------------------------
    cd_bytes = jnp.dtype(compute_dtype).itemsize
    out_bytes = jnp.dtype(logits_dtype).itemsize
    working = (2 * (tm * tk + tn * tk) * cd_bytes       # double-buffered input tiles
               + 2 * tm * tn * out_bytes                # double-buffered logits tile
               + (0 if single_k else tm * tn * 4)       # f32 accumulator
               + 2 * tm * tn * 4                        # finalize temporaries headroom
               + 16 * tm * 4)                           # CE scratch / labels / nll
    # Raise v5e's 16 MiB default scoped limit; stay under v7x's 64 MiB physical.
    vmem_limit = int(min(64 * 1024 * 1024, max(32 * 1024 * 1024, 2 * working)))
    cost = pl.CostEstimate(
        flops=2 * n_pad * v_pad * h_pad,
        transcendentals=(n_pad * v_pad) if with_ce else 0,
        bytes_accessed=int(n_pad * h_pad * cd_bytes
                           + (n_pad // tm) * v_pad * h_pad * cd_bytes
                           + n_pad * v_pad * out_bytes))

    results = pl.pallas_call(
        functools.partial(_lm_head_ce_kernel, v_real=V, v_pad=v_pad,
                          single_k=single_k, with_ce=with_ce),
        out_shape=out_shape,
        grid_spec=pltpu.PrefetchScalarGridSpec(
            num_scalar_prefetch=0, grid=grid,
            in_specs=in_specs, out_specs=out_specs, scratch_shapes=scratch),
        compiler_params=pltpu.CompilerParams(
            dimension_semantics=dims, vmem_limit_bytes=vmem_limit),
        cost_estimate=cost,
    )(*inputs)

    if with_ce:
        logits_p, nll_p = results
    else:
        logits_p = results

    # Avoid the slice copy when no padding was introduced.
    logits_out = logits_p if (n_pad, v_pad) == (N, V) else logits_p[:N, :V]
    if not with_ce:
        return logits_out
    nll_out = nll_p[:, 0] if n_pad == N else nll_p[:N, 0]
    return logits_out, nll_out


# ---------------------------------------------------------------------------
# Wrapper: AdaptiveCausalLmWrapper.forward
# ---------------------------------------------------------------------------
def adaptive_causal_lm_forward(input_ids, wte_weight, labels=None,
                               compute_dtype=jnp.bfloat16,
                               logits_dtype=jnp.float32,
                               tm=512, tn=1024, tk=1024):
    """
    input_ids:  [B, S] int32
    wte_weight: [V, H] (tied: lm_head.weight = wte.weight, as in the module)
    labels:     optional [B, S] int32 (ignore_index = -100, PyTorch semantics)
    Returns (loss_or_None, logits [B, S, V]).
    """
    B, S = input_ids.shape
    V, H = wte_weight.shape

    # Cast the tied weight to the MXU feed dtype once; it is reused for the
    # embedding gather AND the lm_head matmul, so there is no per-call
    # f32->bf16 + pad copy of the [V, H] weight inside the fused call.
    w_c = wte_weight if wte_weight.dtype == compute_dtype else wte_weight.astype(compute_dtype)

    # TODO(synk): the adaptive transformer stack (attention blocks, adaptive gates,
    # U-Net skip connections) is an external submodule of the wrapper; stand in with
    # a tied-embedding lookup so the lm_head / loss hot path is exercised.
    hidden_2d = jnp.take(w_c, input_ids.reshape(-1), axis=0)     # [N, H] compute_dtype

    if labels is not None:
        # Next-token labels for every position (last token per row -> ignore_index),
        # so the kernel consumes the full [N, V] logits with no [:, :-1] copy.
        shift_labels = jnp.concatenate(
            [labels[:, 1:], jnp.full((B, 1), -100, labels.dtype)],
            axis=1).reshape(B * S)
        logits_2d, nll = _fused_lm_head_ce(
            hidden_2d, w_c, shift_labels, tm=tm, tn=tn, tk=tk,
            compute_dtype=compute_dtype, logits_dtype=logits_dtype)
        valid = (shift_labels >= 0) & (shift_labels < V)
        loss = jnp.sum(nll) / jnp.sum(valid.astype(jnp.float32))
    else:
        # Inference fast path: plain tiled matmul, no exp / reductions in-kernel.
        logits_2d = _fused_lm_head_ce(
            hidden_2d, w_c, None, tm=tm, tn=tn, tk=tk,
            compute_dtype=compute_dtype, logits_dtype=logits_dtype)
        loss = None

    logits = logits_2d.reshape(B, S, V)
    return loss, logits


# ---------------------------------------------------------------------------
# Pure-JAX reference (same bf16 matmul feed, f32 accumulation) for verification
# ---------------------------------------------------------------------------
def _reference_forward(input_ids, wte_weight, labels, compute_dtype=jnp.bfloat16):
    w = wte_weight.astype(compute_dtype)
    hidden = jnp.take(w, input_ids, axis=0)
    logits = jax.lax.dot_general(
        hidden, w, dimension_numbers=(((2,), (1,)), ((), ())),
        preferred_element_type=jnp.float32)
    V = wte_weight.shape[0]
    shift_logits = logits[:, :-1, :].reshape(-1, V)
    shift_labels = labels[:, 1:].reshape(-1)
    logp = jax.nn.log_softmax(shift_logits, axis=-1)
    nll = -jnp.take_along_axis(logp, shift_labels[:, None], axis=1)[:, 0]
    valid = (shift_labels >= 0) & (shift_labels < V)
    loss = jnp.sum(jnp.where(valid, nll, 0.0)) / jnp.sum(valid.astype(jnp.float32))
    return loss, logits


if __name__ == "__main__":
    def _check(got, want, atol, rtol, msg):
        assert jnp.allclose(got, want, atol=atol, rtol=rtol), (
            msg, float(jnp.max(jnp.abs(got - want))))

    def _run_case(B, S, H, V):
        key = jax.random.PRNGKey(0)
        k_w, k_ids, k_lab = jax.random.split(key, 3)
        wte_weight = jax.random.normal(k_w, (V, H), dtype=jnp.float32) * 0.02
        input_ids = jax.random.randint(k_ids, (B, S), 0, V, dtype=jnp.int32)
        labels = jax.random.randint(k_lab, (B, S), 0, V, dtype=jnp.int32)

        loss, logits = adaptive_causal_lm_forward(input_ids, wte_weight, labels=labels)
        loss = jax.block_until_ready(loss)
        logits = jax.block_until_ready(logits)
        ref_loss, ref_logits = _reference_forward(input_ids, wte_weight, labels)
        assert logits.shape == (B, S, V)
        _check(logits, ref_logits, 2e-4, 2e-4, "logits")
        _check(loss, ref_loss, 2e-4, 2e-4, "loss")

        # labels=None fast path (logits-only kernel, no CE work).
        loss_n, logits_n = adaptive_causal_lm_forward(input_ids, wte_weight, labels=None)
        logits_n = jax.block_until_ready(logits_n)
        assert loss_n is None
        _check(logits_n, ref_logits, 2e-4, 2e-4, "logits (no labels)")

    # Toy shapes consistent with the module (batch, seq, hidden, vocab).
    _run_case(B=2, S=8, H=32, V=128)
    # Non-aligned shapes: row / hidden padding + last-vocab-tile masking.
    _run_case(B=2, S=7, H=48, V=200)

    # Forced k-split (f32 accumulator) path + multiple vocab tiles with padding,
    # exercised directly with small tile overrides.
    key = jax.random.PRNGKey(0)
    k1, k2, k3 = jax.random.split(key, 3)
    N, H, V = 24, 256, 400
    hid = (jax.random.normal(k1, (N, H), dtype=jnp.float32) * 0.05).astype(jnp.bfloat16)
    w = (jax.random.normal(k2, (V, H), dtype=jnp.float32) * 0.05).astype(jnp.bfloat16)
    lab = jax.random.randint(k3, (N,), 0, V, dtype=jnp.int32)

    logits, nll = _fused_lm_head_ce(hid, w, lab, tm=16, tn=128, tk=128)
    nll = jax.block_until_ready(nll)
    ref_logits = jax.lax.dot_general(hid, w, (((1,), (1,)), ((), ())),
                                     preferred_element_type=jnp.float32)
    logp = jax.nn.log_softmax(ref_logits, axis=-1)
    ref_nll = -jnp.take_along_axis(logp, lab[:, None], axis=1)[:, 0]
    _check(logits, ref_logits, 1e-3, 1e-3, "logits (k-split)")
    _check(nll, ref_nll, 1e-3, 1e-3, "nll (k-split)")

    logits_only = _fused_lm_head_ce(hid, w, None, tm=16, tn=128, tk=128)
    logits_only = jax.block_until_ready(logits_only)
    _check(logits_only, ref_logits, 1e-3, 1e-3, "logits-only (k-split)")

    print("KERNEL_OK")
</pallas_src>

<mosaic_0001>
module attributes {stable_mosaic.version = 11 : i64} {
  func.func @_lm_head_ce_kernel(%arg0: i32, %arg1: i32, %arg2: memref<16x128xbf16, #tpu.memory_space<vmem>>, %arg3: memref<128x128xbf16, #tpu.memory_space<vmem>>, %arg4: memref<16x1xi32, #tpu.memory_space<vmem>>, %arg5: memref<16x128xf32, #tpu.memory_space<vmem>>, %arg6: memref<16x1xf32, #tpu.memory_space<vmem>>, %arg7: memref<16x1xf32, #tpu.memory_space<vmem>>, %arg8: memref<16x1xf32, #tpu.memory_space<vmem>>, %arg9: memref<16x1xf32, #tpu.memory_space<vmem>>) attributes {dimension_semantics = [#tpu.dimension_semantics<parallel>, #tpu.dimension_semantics<arbitrary>], iteration_bounds = array<i64: 1, 1>, scalar_prefetch = 0 : i64, scratch_operands = 3 : i64, tpu.core_type = #tpu.core_type<tc>, window_params = [{transform_indices = @transform_0, window_bounds = array<i64: 16, 128>}, {transform_indices = @transform_1, window_bounds = array<i64: 128, 128>}, {transform_indices = @transform_2, window_bounds = array<i64: 16, 1>}, {transform_indices = @transform_3, window_bounds = array<i64: 16, 128>}, {transform_indices = @transform_4, window_bounds = array<i64: 16, 1>}]} {
    %c0_i32 = arith.constant 0 : i32
    %0 = arith.cmpi eq, %arg1, %c0_i32 : i32
    %1 = arith.extui %0 : i1 to i32
    %c0_i32_0 = arith.constant 0 : i32
    %2 = arith.cmpi ne, %1, %c0_i32_0 : i32
    scf.if %2 {
      %cst_26 = arith.constant 0xFF800000 : f32
      %40 = vector.broadcast %cst_26 : f32 to vector<16x1xf32>
      %c0_27 = arith.constant 0 : index
      %c0_28 = arith.constant 0 : index
      %41 = vector.load %arg7[%c0_27, %c0_28] : memref<16x1xf32, #tpu.memory_space<vmem>>, vector<16x1xf32>
      tpu.vector_store %arg7[%c0_27, %c0_28], %40 {strides = array<i32>} : memref<16x1xf32, #tpu.memory_space<vmem>>, vector<16x1xf32>,
      %cst_29 = arith.constant 0.000000e+00 : f32
      %42 = vector.broadcast %cst_29 : f32 to vector<16x1xf32>
      %c0_30 = arith.constant 0 : index
      %c0_31 = arith.constant 0 : index
      %43 = vector.load %arg8[%c0_30, %c0_31] : memref<16x1xf32, #tpu.memory_space<vmem>>, vector<16x1xf32>
      tpu.vector_store %arg8[%c0_30, %c0_31], %42 {strides = array<i32>} : memref<16x1xf32, #tpu.memory_space<vmem>>, vector<16x1xf32>,
      %cst_32 = arith.constant 0.000000e+00 : f32
      %44 = vector.broadcast %cst_32 : f32 to vector<16x1xf32>
      %c0_33 = arith.constant 0 : index
      %c0_34 = arith.constant 0 : index
      %45 = vector.load %arg9[%c0_33, %c0_34] : memref<16x1xf32, #tpu.memory_space<vmem>>, vector<16x1xf32>
      tpu.vector_store %arg9[%c0_33, %c0_34], %44 {strides = array<i32>} : memref<16x1xf32, #tpu.memory_space<vmem>>, vector<16x1xf32>,
    } else {
    }
    %c0 = arith.constant 0 : index
    %c0_1 = arith.constant 0 : index
    %3 = vector.load %arg2[%c0, %c0_1] : memref<16x128xbf16, #tpu.memory_space<vmem>>, vector<16x128xbf16>
    %c0_2 = arith.constant 0 : index
    %c0_3 = arith.constant 0 : index
    %4 = vector.load %arg3[%c0_2, %c0_3] : memref<128x128xbf16, #tpu.memory_space<vmem>>, vector<128x128xbf16>
    %cst = arith.constant dense<0.000000e+00> : vector<16x128xf32>
    %5 = tpu.matmul %3, %4, %cst {dimension_numbers = #tpu.dot_dimension_numbers<[1], [1], [0], [0], [0, 0, 1, 0], [], []>} : vector<16x128xbf16>, vector<128x128xbf16>, vector<16x128xf32> -> vector<16x128xf32>
    %c0_4 = arith.constant 0 : index
    %c0_5 = arith.constant 0 : index
    %6 = vector.load %arg5[%c0_4, %c0_5] : memref<16x128xf32, #tpu.memory_space<vmem>>, vector<16x128xf32>
    tpu.vector_store %arg5[%c0_4, %c0_5], %5 {strides = array<i32>} : memref<16x128xf32, #tpu.memory_space<vmem>>, vector<16x128xf32>,
    %c128_i32 = arith.constant 128 : i32
    %7 = arith.muli %arg1, %c128_i32 : i32
    %8 = tpu.iota {dimensions = array<i32: 1>} : vector<16x128xi32>
    %9 = vector.broadcast %7 : i32 to vector<16x128xi32>
    %10 = arith.addi %9, %8 : vector<16x128xi32>
    %c0_6 = arith.constant 0 : index
    %c0_7 = arith.constant 0 : index
    %11 = vector.load %arg4[%c0_6, %c0_7] : memref<16x1xi32, #tpu.memory_space<vmem>>, vector<16x1xi32>
    %c0_8 = arith.constant 0 : index
    %c0_9 = arith.constant 0 : index
    %12 = vector.load %arg7[%c0_8, %c0_9] : memref<16x1xf32, #tpu.memory_space<vmem>>, vector<16x1xf32>
    %cst_10 = arith.constant dense<0xFF800000> : vector<16xf32>
    %13 = vector.multi_reduction <maximumf>, %5, %cst_10 [1] : vector<16x128xf32> to vector<16xf32>
    %14 = vector.shape_cast %13 : vector<16xf32> to vector<16x1xf32>
    %15 = arith.maximumf %12, %14 : vector<16x1xf32>
    %16 = vector.broadcast %15 : vector<16x1xf32> to vector<16x128xf32>
    %17 = arith.subf %5, %16 : vector<16x128xf32>
    %18 = math.exp %17 : vector<16x128xf32>
    %c0_11 = arith.constant 0 : index
    %c0_12 = arith.constant 0 : index
    %19 = vector.load %arg8[%c0_11, %c0_12] : memref<16x1xf32, #tpu.memory_space<vmem>>, vector<16x1xf32>
    %20 = arith.subf %12, %15 : vector<16x1xf32>
    %21 = math.exp %20 : vector<16x1xf32>
    %22 = arith.mulf %19, %21 : vector<16x1xf32>
    %cst_13 = arith.constant dense<0.000000e+00> : vector<16xf32>
    %23 = vector.multi_reduction <add>, %18, %cst_13 [1] : vector<16x128xf32> to vector<16xf32>
    %24 = vector.shape_cast %23 : vector<16xf32> to vector<16x1xf32>
    %25 = arith.addf %22, %24 : vector<16x1xf32>
    %c0_14 = arith.constant 0 : index
    %c0_15 = arith.constant 0 : index
    %26 = vector.load %arg8[%c0_14, %c0_15] : memref<16x1xf32, #tpu.memory_space<vmem>>, vector<16x1xf32>
    tpu.vector_store %arg8[%c0_14, %c0_15], %25 {strides = array<i32>} : memref<16x1xf32, #tpu.memory_space<vmem>>, vector<16x1xf32>,
    %c0_16 = arith.constant 0 : index
    %c0_17 = arith.constant 0 : index
    %27 = vector.load %arg7[%c0_16, %c0_17] : memref<16x1xf32, #tpu.memory_space<vmem>>, vector<16x1xf32>
    tpu.vector_store %arg7[%c0_16, %c0_17], %15 {strides = array<i32>} : memref<16x1xf32, #tpu.memory_space<vmem>>, vector<16x1xf32>,
    %c0_18 = arith.constant 0 : index
    %c0_19 = arith.constant 0 : index
    %28 = vector.load %arg9[%c0_18, %c0_19] : memref<16x1xf32, #tpu.memory_space<vmem>>, vector<16x1xf32>
    %29 = vector.broadcast %11 : vector<16x1xi32> to vector<16x128xi32>
    %30 = arith.cmpi eq, %10, %29 : vector<16x128xi32>
    %cst_20 = arith.constant 0.000000e+00 : f32
    %31 = vector.broadcast %cst_20 : f32 to vector<16x128xf32>
    %32 = arith.select %30, %5, %31 : vector<16x128xi1>, vector<16x128xf32>
    %cst_21 = arith.constant dense<0.000000e+00> : vector<16xf32>
    %33 = vector.multi_reduction <add>, %32, %cst_21 [1] : vector<16x128xf32> to vector<16xf32>
    %34 = vector.shape_cast %33 : vector<16xf32> to vector<16x1xf32>
    %35 = arith.addf %28, %34 : vector<16x1xf32>
    %c0_22 = arith.constant 0 : index
    %c0_23 = arith.constant 0 : index
    %36 = vector.load %arg9[%c0_22, %c0_23] : memref<16x1xf32, #tpu.memory_space<vmem>>, vector<16x1xf32>
    tpu.vector_store %arg9[%c0_22, %c0_23], %35 {strides = array<i32>} : memref<16x1xf32, #tpu.memory_space<vmem>>, vector<16x1xf32>,
    %c0_i32_24 = arith.constant 0 : i32
    %37 = arith.cmpi eq, %arg1, %c0_i32_24 : i32
    %38 = arith.extui %37 : i1 to i32
    %c0_i32_25 = arith.constant 0 : i32
    %39 = arith.cmpi ne, %38, %c0_i32_25 : i32
    scf.if %39 {
      %c0_i32_26 = arith.constant 0 : i32
      %40 = vector.broadcast %c0_i32_26 : i32 to vector<16x1xi32>
      %41 = arith.cmpi sge, %11, %40 : vector<16x1xi32>
      %c128_i32_27 = arith.constant 128 : i32
      %42 = vector.broadcast %c128_i32_27 : i32 to vector<16x1xi32>
      %43 = arith.cmpi slt, %11, %42 : vector<16x1xi32>
      %44 = arith.andi %41, %43 : vector<16x1xi1>
      %c0_28 = arith.constant 0 : index
      %c0_29 = arith.constant 0 : index
      %45 = vector.load %arg7[%c0_28, %c0_29] : memref<16x1xf32, #tpu.memory_space<vmem>>, vector<16x1xf32>
      %c0_30 = arith.constant 0 : index
      %c0_31 = arith.constant 0 : index
      %46 = vector.load %arg8[%c0_30, %c0_31] : memref<16x1xf32, #tpu.memory_space<vmem>>, vector<16x1xf32>
      %47 = math.log %46 : vector<16x1xf32>
      %48 = arith.addf %45, %47 : vector<16x1xf32>
      %c0_32 = arith.constant 0 : index
      %c0_33 = arith.constant 0 : index
      %49 = vector.load %arg9[%c0_32, %c0_33] : memref<16x1xf32, #tpu.memory_space<vmem>>, vector<16x1xf32>
      %50 = arith.subf %48, %49 : vector<16x1xf32>
      %cst_34 = arith.constant 0.000000e+00 : f32
      %51 = vector.broadcast %cst_34 : f32 to vector<16x1xf32>
      %52 = arith.select %44, %50, %51 : vector<16x1xi1>, vector<16x1xf32>
      %c0_35 = arith.constant 0 : index
      %c0_36 = arith.constant 0 : index
      %53 = vector.load %arg6[%c0_35, %c0_36] : memref<16x1xf32, #tpu.memory_space<vmem>>, vector<16x1xf32>
      tpu.vector_store %arg6[%c0_35, %c0_36], %52 {strides = array<i32>} : memref<16x1xf32, #tpu.memory_space<vmem>>, vector<16x1xf32>,
    } else {
    }
    return
  }
  func.func @transform_0(%arg0: i32, %arg1: i32) -> (i32, i32) {
    %c0_i32 = arith.constant 0 : i32
    %c0_i32_0 = arith.constant 0 : i32
    return %arg0, %c0_i32 : i32, i32
  }
  func.func @transform_1(%arg0: i32, %arg1: i32) -> (i32, i32) {
    %c0_i32 = arith.constant 0 : i32
    %c0_i32_0 = arith.constant 0 : i32
    return %arg1, %c0_i32 : i32, i32
  }
  func.func @transform_2(%arg0: i32, %arg1: i32) -> (i32, i32) {
    %c0_i32 = arith.constant 0 : i32
    %c0_i32_0 = arith.constant 0 : i32
    return %arg0, %c0_i32 : i32, i32
  }
  func.func @transform_3(%arg0: i32, %arg1: i32) -> (i32, i32) {
    %c0_i32 = arith.constant 0 : i32
    return %arg0, %arg1 : i32, i32
  }
  func.func @transform_4(%arg0: i32, %arg1: i32) -> (i32, i32) {
    %c0_i32 = arith.constant 0 : i32
    %c0_i32_0 = arith.constant 0 : i32
    return %arg0, %c0_i32 : i32, i32
  }
}

</mosaic_0001>

<bundles_post_ra>
// kernel: tpu_custom_call.1
= control target key start
LH: loop header
LB: loop body
LE: loop exit
PB: predicated region body
PF: predicated region fallthrough
CT: control target
= control target key end

     0   :  { %10 = vsyncpa [#allocation6], 0  ;;  %s473_s0 = inlined_call_operand.vmem [shape: bf16[16,128], index: 0, kind: input, shape index: {}]   ;;  %s474_s1 = inlined_call_operand.hbm [shape: bf16[128,128], index: 1, kind: input, shape index: {}]   ;;  %s475_s2 = inlined_call_operand.vmem [shape: s32[16,1], index: 2, kind: input, shape index: {}]   ;;  %s476_s3 = inlined_call_operand.hbm [shape: f32[16,128], index: 3, kind: output, shape index: {0}]   ;;  %s477_s4 = inlined_call_operand.vmem [shape: f32[16,1], index: 4, kind: output, shape index: {1}]  }
   0x1   :  { %11 = vsyncpa [#allocation7], 0  ;;  %s393_s15 = smov [#allocation5]  }
   0x2   :  { %s19_s16 = sshll.u32 %s393_s15, 4  ;;  %s20_s16 = int_to_ptr.vmem [resolvable:$true] %s19_s16 }
   0x3   :  { %s357_s17 = scalar_lea.vmem %s20_s16, 1024  ;;  %p362_p1 = scmp.lt.s32.totalorder %s20_s16, %s20_s16 }
   0x4   :  { %p358_p0 = scmp.ne.s32.totalorder %s20_s16, %s357_s17  ;;  %p363_p2 = scmp.lt.s32.totalorder %s357_s17, %s357_s17 }
   0x6   :  { %p364_p3 = por %p363_p2, %p362_p1 }
   0x8   :  { %p365_p4 = pnand %p364_p3, %p358_p0 }
   0xa   :  { %368 = shalt.err (!%p365_p4)
}
   0xb   :  { %s394_s18 = smov 64   ;;  %s395_s19 = smov 4  }
   0xc   :  { %25 = dma.hbm_to_vmem [thread:$0]  %s474_s1, 1024, %s20_s16, [#allocation6], %s394_s18, %s394_s18, %s395_s19  }
   0xd   :  { %389 = dma.done.wait [#allocation6], 1024  }
   0xe   :  { %390 = vsyncadd [#allocation6], 4294966272  ;;  %v396_v0 = vmov 0.0   ;;  %vm397_vm0 = vmmov 0   ;;  %v328_v1 = vld [vmem:[#allocation5 + $0x38] sm:$0xff]   ;;  %v329_v2 = vld [vmem:[#allocation5 + $0x30] sm:$0xff]   ;;  %v159_v24 = vlaneseq }
   0xf   :  { %296 = vmatprep.subr.bf16.mxu0 %v396_v0  ;;  %312 = vmatprep.mubr.msk.bf16.mxu0 %vm397_vm0, %v396_v0  ;;  %v330_v3 = vld [vmem:[#allocation5 + $0x28] sm:$0xff]   ;;  %v331_v4 = vld [vmem:[#allocation5 + $0x20] sm:$0xff]   ;;  %v332_v5 = vld [vmem:[#allocation5 + $0x18] sm:$0xff]   ;;  %v398_v10 = vmov 0   ;;  %vm36_vm1 = vcmask 7168   ;;  %v399_v11 = vmov -inf  }
  0x10   :  { %297 = vmatpush3.bf16.xpose.msra.mxu0 %v328_v1  ;;  %v333_v6 = vld [vmem:[#allocation5 + $0x10] sm:$0xff]   ;;  %v334_v7 = vld [vmem:[#allocation5 + $0x8] sm:$0xff]   ;;  %v335_v8 = vld [vmem:[#allocation5] sm:$0xff]   ;;  %327 = vset.pattern.permute.xlu0 %v398_v10  ;;  %37 = vst.msk [vmem:[#allocation2] sm:$0xff] %vm36_vm1, %v399_v11  ;;  %v160_v27 = vand.u32 127, %v159_v24 }
  0x11   :  { %298 = vmatprep.subr.bf16.mxu0 %v396_v0  ;;  %v336_v9 = vld [vmem:[%s473_s0] sm:$0xff]   ;;  %326 = vset.pattern.permute.xlu1 %v398_v10  ;;  %38 = vst.msk [vmem:[#allocation2 + $0x8] sm:$0xff] %vm36_vm1, %v399_v11  ;;  %39 = vst.msk [vmem:[#allocation3] sm:$0xff] %vm36_vm1, %v396_v0  ;;  %v451_v26 = vld [vmem:[%s475_s2 + $0x8] sm:$0xff] }
  0x12   :  { %40 = vst.msk [vmem:[#allocation3 + $0x8] sm:$0xff] %vm36_vm1, %v396_v0  ;;  %41 = vst.msk [vmem:[#allocation4] sm:$0xff] %vm36_vm1, %v396_v0  ;;  %v443_v16 = vld [vmem:[%s475_s2] sm:$0xff]  ;;  %s400_s2 = smov [#allocation8]  }
  0x13   :  { %42 = vst.msk [vmem:[#allocation4 + $0x8] sm:$0xff] %vm36_vm1, %v396_v0  ;;  %s262_s26 = sshll.u32 %s400_s2, 4  ;;  %s263_s26 = int_to_ptr.vmem [resolvable:$true] %s262_s26 }
  0x14   :  { %s369_s27 = scalar_lea.vmem %s263_s26, 256  ;;  %p374_p6 = scmp.lt.s32.totalorder %s263_s26, %s263_s26 }
  0x15   :  { %p370_p5 = scmp.ne.s32.totalorder %s263_s26, %s369_s27  ;;  %p375_p7 = scmp.lt.s32.totalorder %s369_s27, %s369_s27 }
  0x17   :  { %v165_v17 = vld [vmem:[#allocation2] sm:$0xff]  ;;  %p376_p8 = por %p375_p7, %p374_p6 }
  0x18   :  { %299 = vmatpush3.bf16.xpose.msra.mxu0 %v329_v2  ;;  %v166_v20 = vld [vmem:[#allocation2 + $0x8] sm:$0xff] }
  0x19   :  { %300 = vmatprep.subr.bf16.mxu0 %v396_v0  ;;  %v210_v39 = vld [vmem:[#allocation4] sm:$0xff]  ;;  %p377_p9 = pnand %p376_p8, %p370_p5 }
  0x20   :  { %301 = vmatpush3.bf16.xpose.msra.mxu0 %v330_v3 }
  0x21   :  { %302 = vmatprep.subr.bf16.mxu0 %v396_v0 }
  0x28   :  { %303 = vmatpush3.bf16.xpose.msra.mxu0 %v331_v4 }
  0x29   :  { %304 = vmatprep.subr.bf16.mxu0 %v396_v0 }
  0x30   :  { %305 = vmatpush3.bf16.xpose.msra.mxu0 %v332_v5 }
  0x31   :  { %306 = vmatprep.subr.bf16.mxu0 %v396_v0 }
  0x38   :  { %307 = vmatpush3.bf16.xpose.msra.mxu0 %v333_v6 }
  0x39   :  { %308 = vmatprep.subr.bf16.mxu0 %v396_v0 }
  0x40   :  { %309 = vmatpush3.bf16.xpose.msra.mxu0 %v334_v7 }
  0x41   :  { %310 = vmatprep.subr.bf16.mxu0 %v396_v0 }
  0x48   :  { %311 = vmatpush3.bf16.xpose.msra.mxu0 %v335_v8 }
  0x4f   :  { %313 = vmatmul.mubr.bf16.vlgmr.msra.gmra.mxu0 %v336_v9 }
 0x10f   :  { %v149_v12 = vpop.f32.mrf.mxu0 }
 0x110   :  { %156 = vst [vmem:[#allocation8] sm:$0xff] %v149_v12  ;;  %167 = vmax.xlane.f32.xlu0 %v149_v12 }
 0x111   :  { %v314_v13 = vpop.f32.mrf.mxu0 }
 0x113   :  { %v152_v14 = vpop.f32.mrf.mxu0 }
 0x114   :  { %157 = vst [vmem:[#allocation8 + $0x8] sm:$0xff] %v152_v14  ;;  %169 = vmax.xlane.f32.xlu0 %v152_v14 }
 0x115   :  { %v315_v15 = vpop.f32.mrf.mxu0 }
 0x12a   :  { %213 = vperm.xlu0 %327, %v443_v16  }
 0x199   :  { %v168_v18 = vpop.xlane.xlu0 %167 }
 0x19a   :  { %v171_v19 = vmax.f32 %v165_v17, %v168_v18 }
 0x19c   :  { %v191_v21 = vsub.f32 %v165_v17, %v171_v19  ;;  %208 = vst.msk [vmem:[#allocation2] sm:$0xff] %vm36_vm1, %v171_v19  ;;  %175 = vperm.xlu1 %326, %v171_v19  }
 0x19d   :  { %v170_v22 = vpop.xlane.xlu0 %169 }
 0x19e   :  { %v172_v23 = vmax.f32 %v166_v20, %v170_v22 }
 0x1a0   :  { %v192_v25 = vsub.f32 %v166_v20, %v172_v23  ;;  %209 = vst.msk [vmem:[#allocation2 + $0x8] sm:$0xff] %vm36_vm1, %v172_v23  ;;  %180 = vperm.xlu1 %326, %v172_v23  }
 0x1a4   :  { %216 = vperm.xlu1 %326, %v451_v26  }
 0x1a5   :  { %v214_v28 = vpop.permute.xlu0 %213 }
 0x1a6   :  { %vm218_vm2 = vcmp.eq.s32.totalorder %v160_v27, %v214_v28 }
 0x1a7   :  { %v220_v29 = vsel %vm218_vm2, %v149_v12, 0.0 }
 0x1a8   :  { %222 = vadd.xlane.f32.xlu0 %v220_v29 }
 0x217   :  { %v176_v30 = vpop.permute.xlu1 %175 }
 0x218   :  { %v183_v31 = vsub.f32 %v149_v12, %v176_v30 }
 0x21a   :  { %v185_v32 = vmul.f32 1.442695, %v183_v31 }
 0x21b   :  { %v181_v33 = vpop.permute.xlu1 %180 }
 0x21c   :  { %337 = vpow2.f32 %v185_v32  ;;  %v184_v34 = vsub.f32 %v152_v14, %v181_v33 }
 0x21e   :  { %v187_v35 = vmul.f32 1.442695, %v184_v34 }
 0x21f   :  { %v217_v37 = vpop.permute.xlu1 %216 }
 0x220   :  { %339 = vpow2.f32 %v187_v35  ;;  %vm219_vm3 = vcmp.eq.s32.totalorder %v160_v27, %v217_v37 }
 0x221   :  { %v221_v41 = vsel %vm219_vm3, %v152_v14, 0.0 }
 0x229   :  { %v338_v36 = vpop.eup %337 }
 0x22a   :  { %199 = vadd.xlane.f32.xlu1 %v338_v36 }
 0x22d   :  { %v340_v38 = vpop.eup %339 }
 0x22e   :  { %201 = vadd.xlane.f32.xlu1 %v340_v38 }
 0x231   :  { %v223_v40 = vpop.xlane.xlu0 %222 }
 0x232   :  { %v226_v42 = vadd.f32 %v223_v40, %v210_v39  ;;  %224 = vadd.xlane.f32.xlu1 %v221_v41 }
 0x234   :  { %228 = vst.msk [vmem:[#allocation4] sm:$0xff] %vm36_vm1, %v226_v42 }
 0x235   :  { %380 = shalt.err (!%p377_p9)
}
 0x236   :  { %s401_s28 = smov 128   ;;  %s402_s29 = smov 8   ;;  %v193_v43 = vmul.f32 1.442695, %v191_v21  ;;  %v195_v44 = vmul.f32 1.442695, %v192_v25 }
 0x237   :  { %268 = dma.vmem_to_hbm [thread:$0]  %s263_s26, 256, %s476_s3, [#allocation7], %s401_s28, %s401_s28, %s402_s29   ;;  %v189_v46 = vld [vmem:[#allocation3] sm:$0xff]  ;;  %v190_v50 = vld [vmem:[#allocation3 + $0x8] sm:$0xff]  ;;  %v211_v55 = vld [vmem:[#allocation4 + $0x8] sm:$0xff]  ;;  %vm233_vm4 = vcmp.ge.s32.totalorder %v443_v16, 0 }
 0x238   :  { %341 = vpow2.f32 %v193_v43  ;;  %vm235_vm5 = vcmp.lt.s32.totalorder %v443_v16, 128  ;;  %v239_v62 = vld [vmem:[#allocation2] sm:$0xff]  ;;  %vm234_vm7 = vcmp.ge.s32.totalorder %v451_v26, 0  ;;  %vm236_vm8 = vcmp.lt.s32.totalorder %v451_v26, 128  ;;  %v240_v4 = vld [vmem:[#allocation2 + $0x8] sm:$0xff] }
 0x239   :  { %343 = vpow2.f32 %v195_v44  ;;  %vm237_vm6 = vmand %vm233_vm4, %vm235_vm5 }
 0x23a   :  { %vm238_vm9 = vmand %vm234_vm7, %vm236_vm8 }
 0x23b   :  { %v249_v1 = vld [vmem:[#allocation4] sm:$0xff] }
 0x245   :  { %v342_v45 = vpop.eup %341 }
 0x246   :  { %v197_v47 = vmul.f32 %v342_v45, %v189_v46  ;;  %v344_v48 = vpop.eup %343 }
 0x247   :  { %v198_v52 = vmul.f32 %v344_v48, %v190_v50 }
 0x2b3   :  { %v200_v49 = vpop.xlane.xlu1 %199 }
 0x2b4   :  { %v203_v51 = vadd.f32 %v200_v49, %v197_v47 }
 0x2b6   :  { %206 = vst.msk [vmem:[#allocation3] sm:$0xff] %vm36_vm1, %v203_v51 }
 0x2b7   :  { %v202_v53 = vpop.xlane.xlu1 %201 }
 0x2b8   :  { %v204_v54 = vadd.f32 %v202_v53, %v198_v52 }
 0x2ba   :  { %207 = vst.msk [vmem:[#allocation3 + $0x8] sm:$0xff] %vm36_vm1, %v204_v54 }
 0x2bb   :  { %v225_v56 = vpop.xlane.xlu1 %224 }
 0x2bc   :  { %v227_v57 = vadd.f32 %v225_v56, %v211_v55 }
 0x2bd   :  { %v241_v58 = vld [vmem:[#allocation3] sm:$0xff] }
 0x2be   :  { %345 = vlog2.f32 %v241_v58  ;;  %229 = vst.msk [vmem:[#allocation4 + $0x8] sm:$0xff] %vm36_vm1, %v227_v57 }
 0x2c1   :  { %v242_v59 = vld [vmem:[#allocation3 + $0x8] sm:$0xff] }
 0x2c2   :  { %347 = vlog2.f32 %v242_v59 }
 0x2c5   :  { %v250_v7 = vld [vmem:[#allocation4 + $0x8] sm:$0xff] }
 0x2cb   :  { %v346_v60 = vpop.eup %345 }
 0x2cc   :  { %v244_v61 = vmul.f32 0.6931472, %v346_v60 }
 0x2ce   :  { %v247_v63 = vadd.f32 %v244_v61, %v239_v62 }
 0x2cf   :  { %v348_v0 = vpop.eup %347 }
 0x2d0   :  { %v251_v2 = vsub.f32 %v247_v63, %v249_v1  ;;  %v246_v3 = vmul.f32 0.6931472, %v348_v0 }
 0x2d2   :  { %v253_v5 = vsel %vm237_vm6, %v251_v2, 0.0  ;;  %v248_v6 = vadd.f32 %v246_v3, %v240_v4 }
 0x2d3   :  { %255 = vst.msk [vmem:[%s477_s4] sm:$0xff] %vm36_vm1, %v253_v5 }
 0x2d4   :  { %v252_v8 = vsub.f32 %v248_v6, %v250_v7 }
 0x2d6   :  { %v254_v9 = vsel %vm238_vm9, %v252_v8, 0.0 }
 0x2d7   :  { %256 = vst.msk [vmem:[%s477_s4 + $0x8] sm:$0xff] %vm36_vm1, %v254_v9 }
 0x2d8   :  { %391 = dma.done.wait [#allocation7], 256  }
 0x2d9   :  { %392 = vsyncadd [#allocation7], 4294967040 }
 0x2da   :  { %276 = vsyncpa [#allocation6], 1 }
 0x2db   :  { %277 = vsyncpa [#allocation7], 1 }

</bundles_post_ra>
